<compile_context>
chip_gen: v7x
topology: tpu7x:2x2x1
jax: 0.10.0
libtpu: 0.0.40
codegen_flags: <defaults>
</compile_context>

<pallas_src>
import jax
import jax.numpy as jnp
from jax.experimental import pallas as pl
from jax.experimental.pallas import tpu as pltpu

EPS = 1e-5
F_PAD = 128  # lane-dense padded feature width


def _bn_block(x, w, b):
    """(folded) Linear -> ReLU -> BatchNorm1d normalize (batch mean, biased var)."""
    h = jnp.dot(x, w, preferred_element_type=jnp.float32) + b
    h = jnp.maximum(h, 0.0)
    mean = jnp.mean(h, axis=0, keepdims=True)
    d = h - mean                       # reused for variance AND normalize
    var = jnp.mean(d * d, axis=0, keepdims=True)
    return d * jax.lax.rsqrt(var + EPS)


def mlp_kernel(x_ref,
               w1_ref, w2_ref, w3_ref, w4_ref, w5_ref,
               b1_ref, b2_ref, b3_ref, b4_ref, b5_ref,
               o_ref):
    x = x_ref[...].astype(jnp.float32)
    x = _bn_block(x, w1_ref[...], b1_ref[...])
    x = _bn_block(x, w2_ref[...], b2_ref[...])
    x = _bn_block(x, w3_ref[...], b3_ref[...])
    x = _bn_block(x, w4_ref[...], b4_ref[...])
    out = jnp.dot(x, w5_ref[...], preferred_element_type=jnp.float32) + b5_ref[...]
    o_ref[...] = out.astype(o_ref.dtype)   # full (B, 128) lane-dense store


def _full_spec(shape):
    # Full-array block; trailing dims equal the full array dims so the
    # (8, 128) divisibility rule does not apply (and padded dims are 128-dense).
    return pl.BlockSpec(shape, lambda i: tuple(0 for _ in shape))


def prepare_params(params):
    """Fold BN affine into the following linear and zero-pad features to 128.

    `params` is the flat PyTorch-layout tuple from init_params:
      [W1, b1, g1, be1, W2, b2, g2, be2, W3, b3, g3, be3, W4, b4, g4, be4, W5, b5]
    with W stored as (in, out) and row vectors as (1, out).
    Returns (weights, biases): 5 padded weights + 5 padded biases.
    """
    p = list(params)
    ws, bs, gs, betas = [], [], [], []
    idx = 0
    for _ in range(4):
        ws.append(p[idx]); bs.append(p[idx + 1])
        gs.append(p[idx + 2]); betas.append(p[idx + 3])
        idx += 4
    w5, b5 = p[idx], p[idx + 1]

    # Fold: y_i = n_i*gamma_i + beta_i  ==>  y_i @ W_{i+1} + b_{i+1}
    #       = n_i @ (diag(gamma_i) W_{i+1}) + (b_{i+1} + beta_i @ W_{i+1})
    fused_w = [ws[0]]
    fused_b = [bs[0]]
    next_w = ws[1:] + [w5]
    next_b = bs[1:] + [b5]
    for i in range(4):
        fused_w.append(gs[i].reshape(-1, 1) * next_w[i])
        fused_b.append(next_b[i] + betas[i] @ next_w[i])

    def pad_w(w, pad_in):
        fin, fout = w.shape
        return jnp.pad(w, ((0, pad_in - fin), (0, F_PAD - fout)))

    def pad_b(b):
        return jnp.pad(b, ((0, 0), (0, F_PAD - b.shape[1])))

    weights, biases = [], []
    for i, (w, b) in enumerate(zip(fused_w, fused_b)):
        pad_in = w.shape[0] if i == 0 else F_PAD  # keep layer-1 input dim at 12
        weights.append(pad_w(w, pad_in))
        biases.append(pad_b(b))
    return tuple(weights), tuple(biases)


def mymodel_forward(x, params):
    """x: (B, 12) f32.  params: flat tuple (PyTorch layout, see prepare_params)."""
    B = x.shape[0]
    weights, biases = prepare_params(params)   # trace-time algebra, not in-kernel
    args = (x,) + weights + biases
    in_specs = [_full_spec(a.shape) for a in args]
    out_padded = pl.pallas_call(
        mlp_kernel,
        out_shape=jax.ShapeDtypeStruct((B, F_PAD), jnp.float32),
        grid_spec=pltpu.PrefetchScalarGridSpec(
            num_scalar_prefetch=0,
            grid=(1,),
            in_specs=in_specs,
            out_specs=_full_spec((B, F_PAD)),
        ),
        compiler_params=pltpu.CompilerParams(
            dimension_semantics=("arbitrary",)),
    )(*args)
    return out_padded[:, :5]


def init_params(key):
    """Deterministic parameter init.

    Linear: W ~ U(-1/sqrt(fan_in), 1/sqrt(fan_in)) stored as (in, out); same for bias.
    BatchNorm1d: PyTorch defaults are gamma=1, beta=0, but we randomize them
    here so the correctness check actually exercises the BN-affine fold.
    """
    dims = [(12, 24), (24, 36), (36, 48), (48, 48), (48, 5)]
    params = []
    keys = jax.random.split(key, 4 * len(dims))
    for i, (fin, fout) in enumerate(dims):
        bound = 1.0 / (fin ** 0.5)
        w = jax.random.uniform(keys[4 * i], (fin, fout), jnp.float32,
                               minval=-bound, maxval=bound)
        b = jax.random.uniform(keys[4 * i + 1], (1, fout), jnp.float32,
                               minval=-bound, maxval=bound)
        params.append(w)
        params.append(b)
        if i < 4:  # BN follows the first 4 linears
            g = 1.0 + 0.1 * jax.random.normal(keys[4 * i + 2], (1, fout), jnp.float32)
            be = 0.1 * jax.random.normal(keys[4 * i + 3], (1, fout), jnp.float32)
            params.append(g)
            params.append(be)
    return tuple(params)


def reference_forward(x, params):
    """Pure-JAX reference (unfolded, unpadded) for correctness checking."""
    p = list(params)
    idx = 0
    for _ in range(4):
        w, b, g, be = p[idx], p[idx + 1], p[idx + 2], p[idx + 3]
        idx += 4
        h = jnp.maximum(x @ w + b, 0.0)
        mean = jnp.mean(h, axis=0, keepdims=True)
        var = jnp.mean((h - mean) ** 2, axis=0, keepdims=True)
        x = (h - mean) * jax.lax.rsqrt(var + EPS) * g + be
    w, b = p[idx], p[idx + 1]
    return x @ w + b


if __name__ == "__main__":
    key = jax.random.PRNGKey(0)
    kx, kp = jax.random.split(key)
    B = 8
    x = jax.random.normal(kx, (B, 12), jnp.float32)
    params = init_params(kp)

    out = mymodel_forward(x, params)
    out = jax.block_until_ready(out)

    ref = reference_forward(x, params)
    assert out.shape == (B, 5), out.shape
    assert jnp.allclose(out, ref, atol=1e-4, rtol=1e-4), (
        float(jnp.max(jnp.abs(out - ref))))
    print("KERNEL_OK")
</pallas_src>

<mosaic_0001>
module attributes {stable_mosaic.version = 11 : i64} {
  func.func @mlp_kernel(%arg0: i32, %arg1: memref<8x12xf32, #tpu.memory_space<vmem>>, %arg2: memref<12x128xf32, #tpu.memory_space<vmem>>, %arg3: memref<128x128xf32, #tpu.memory_space<vmem>>, %arg4: memref<128x128xf32, #tpu.memory_space<vmem>>, %arg5: memref<128x128xf32, #tpu.memory_space<vmem>>, %arg6: memref<128x128xf32, #tpu.memory_space<vmem>>, %arg7: memref<1x128xf32, #tpu.memory_space<vmem>>, %arg8: memref<1x128xf32, #tpu.memory_space<vmem>>, %arg9: memref<1x128xf32, #tpu.memory_space<vmem>>, %arg10: memref<1x128xf32, #tpu.memory_space<vmem>>, %arg11: memref<1x128xf32, #tpu.memory_space<vmem>>, %arg12: memref<8x128xf32, #tpu.memory_space<vmem>>) attributes {dimension_semantics = [#tpu.dimension_semantics<arbitrary>], iteration_bounds = array<i64: 1>, scalar_prefetch = 0 : i64, scratch_operands = 0 : i64, tpu.core_type = #tpu.core_type<tc>, window_params = [{pipeline_mode = #tpu.pipeline_mode<synchronous>, transform_indices = @transform_0, window_bounds = array<i64: 8, 12>}, {pipeline_mode = #tpu.pipeline_mode<synchronous>, transform_indices = @transform_1, window_bounds = array<i64: 12, 128>}, {pipeline_mode = #tpu.pipeline_mode<synchronous>, transform_indices = @transform_2, window_bounds = array<i64: 128, 128>}, {pipeline_mode = #tpu.pipeline_mode<synchronous>, transform_indices = @transform_3, window_bounds = array<i64: 128, 128>}, {pipeline_mode = #tpu.pipeline_mode<synchronous>, transform_indices = @transform_4, window_bounds = array<i64: 128, 128>}, {pipeline_mode = #tpu.pipeline_mode<synchronous>, transform_indices = @transform_5, window_bounds = array<i64: 128, 128>}, {pipeline_mode = #tpu.pipeline_mode<synchronous>, transform_indices = @transform_6, window_bounds = array<i64: 1, 128>}, {pipeline_mode = #tpu.pipeline_mode<synchronous>, transform_indices = @transform_7, window_bounds = array<i64: 1, 128>}, {pipeline_mode = #tpu.pipeline_mode<synchronous>, transform_indices = @transform_8, window_bounds = array<i64: 1, 128>}, {pipeline_mode = #tpu.pipeline_mode<synchronous>, transform_indices = @transform_9, window_bounds = array<i64: 1, 128>}, {pipeline_mode = #tpu.pipeline_mode<synchronous>, transform_indices = @transform_10, window_bounds = array<i64: 1, 128>}, {pipeline_mode = #tpu.pipeline_mode<synchronous>, transform_indices = @transform_11, window_bounds = array<i64: 8, 128>}]} {
    %c0 = arith.constant 0 : index
    %c0_0 = arith.constant 0 : index
    %0 = vector.load %arg1[%c0, %c0_0] : memref<8x12xf32, #tpu.memory_space<vmem>>, vector<8x12xf32>
    %c0_1 = arith.constant 0 : index
    %c0_2 = arith.constant 0 : index
    %1 = vector.load %arg2[%c0_1, %c0_2] : memref<12x128xf32, #tpu.memory_space<vmem>>, vector<12x128xf32>
    %c0_3 = arith.constant 0 : index
    %c0_4 = arith.constant 0 : index
    %2 = vector.load %arg7[%c0_3, %c0_4] : memref<1x128xf32, #tpu.memory_space<vmem>>, vector<1x128xf32>
    %cst = arith.constant dense<0.000000e+00> : vector<8x128xf32>
    %3 = tpu.matmul %0, %1, %cst {dimension_numbers = #tpu.dot_dimension_numbers<[1], [0], [0], [1], [0, 0, 1, 1], [], []>} : vector<8x12xf32>, vector<12x128xf32>, vector<8x128xf32> -> vector<8x128xf32>
    %4 = vector.broadcast %2 : vector<1x128xf32> to vector<8x128xf32>
    %5 = arith.addf %3, %4 : vector<8x128xf32>
    %cst_5 = arith.constant 0.000000e+00 : f32
    %6 = vector.broadcast %cst_5 : f32 to vector<8x128xf32>
    %7 = arith.maximumf %5, %6 : vector<8x128xf32>
    %cst_6 = arith.constant dense<0.000000e+00> : vector<128xf32>
    %8 = vector.multi_reduction <add>, %7, %cst_6 [0] : vector<8x128xf32> to vector<128xf32>
    %9 = vector.shape_cast %8 : vector<128xf32> to vector<1x128xf32>
    %cst_7 = arith.constant 8.000000e+00 : f32
    %10 = vector.broadcast %cst_7 : f32 to vector<1x128xf32>
    %11 = arith.divf %9, %10 : vector<1x128xf32>
    %12 = vector.broadcast %11 : vector<1x128xf32> to vector<8x128xf32>
    %13 = arith.subf %7, %12 : vector<8x128xf32>
    %14 = arith.mulf %13, %13 : vector<8x128xf32>
    %cst_8 = arith.constant dense<0.000000e+00> : vector<128xf32>
    %15 = vector.multi_reduction <add>, %14, %cst_8 [0] : vector<8x128xf32> to vector<128xf32>
    %16 = vector.shape_cast %15 : vector<128xf32> to vector<1x128xf32>
    %cst_9 = arith.constant 8.000000e+00 : f32
    %17 = vector.broadcast %cst_9 : f32 to vector<1x128xf32>
    %18 = arith.divf %16, %17 : vector<1x128xf32>
    %cst_10 = arith.constant 9.99999974E-6 : f32
    %19 = vector.broadcast %cst_10 : f32 to vector<1x128xf32>
    %20 = arith.addf %18, %19 : vector<1x128xf32>
    %21 = math.rsqrt %20 : vector<1x128xf32>
    %22 = vector.broadcast %21 : vector<1x128xf32> to vector<8x128xf32>
    %23 = arith.mulf %13, %22 : vector<8x128xf32>
    %c0_11 = arith.constant 0 : index
    %c0_12 = arith.constant 0 : index
    %24 = vector.load %arg3[%c0_11, %c0_12] : memref<128x128xf32, #tpu.memory_space<vmem>>, vector<128x128xf32>
    %c0_13 = arith.constant 0 : index
    %c0_14 = arith.constant 0 : index
    %25 = vector.load %arg8[%c0_13, %c0_14] : memref<1x128xf32, #tpu.memory_space<vmem>>, vector<1x128xf32>
    %cst_15 = arith.constant dense<0.000000e+00> : vector<8x128xf32>
    %26 = tpu.matmul %23, %24, %cst_15 {dimension_numbers = #tpu.dot_dimension_numbers<[1], [0], [0], [1], [0, 0, 1, 1], [], []>} : vector<8x128xf32>, vector<128x128xf32>, vector<8x128xf32> -> vector<8x128xf32>
    %27 = vector.broadcast %25 : vector<1x128xf32> to vector<8x128xf32>
    %28 = arith.addf %26, %27 : vector<8x128xf32>
    %cst_16 = arith.constant 0.000000e+00 : f32
    %29 = vector.broadcast %cst_16 : f32 to vector<8x128xf32>
    %30 = arith.maximumf %28, %29 : vector<8x128xf32>
    %cst_17 = arith.constant dense<0.000000e+00> : vector<128xf32>
    %31 = vector.multi_reduction <add>, %30, %cst_17 [0] : vector<8x128xf32> to vector<128xf32>
    %32 = vector.shape_cast %31 : vector<128xf32> to vector<1x128xf32>
    %cst_18 = arith.constant 8.000000e+00 : f32
    %33 = vector.broadcast %cst_18 : f32 to vector<1x128xf32>
    %34 = arith.divf %32, %33 : vector<1x128xf32>
    %35 = vector.broadcast %34 : vector<1x128xf32> to vector<8x128xf32>
    %36 = arith.subf %30, %35 : vector<8x128xf32>
    %37 = arith.mulf %36, %36 : vector<8x128xf32>
    %cst_19 = arith.constant dense<0.000000e+00> : vector<128xf32>
    %38 = vector.multi_reduction <add>, %37, %cst_19 [0] : vector<8x128xf32> to vector<128xf32>
    %39 = vector.shape_cast %38 : vector<128xf32> to vector<1x128xf32>
    %cst_20 = arith.constant 8.000000e+00 : f32
    %40 = vector.broadcast %cst_20 : f32 to vector<1x128xf32>
    %41 = arith.divf %39, %40 : vector<1x128xf32>
    %cst_21 = arith.constant 9.99999974E-6 : f32
    %42 = vector.broadcast %cst_21 : f32 to vector<1x128xf32>
    %43 = arith.addf %41, %42 : vector<1x128xf32>
    %44 = math.rsqrt %43 : vector<1x128xf32>
    %45 = vector.broadcast %44 : vector<1x128xf32> to vector<8x128xf32>
    %46 = arith.mulf %36, %45 : vector<8x128xf32>
    %c0_22 = arith.constant 0 : index
    %c0_23 = arith.constant 0 : index
    %47 = vector.load %arg4[%c0_22, %c0_23] : memref<128x128xf32, #tpu.memory_space<vmem>>, vector<128x128xf32>
    %c0_24 = arith.constant 0 : index
    %c0_25 = arith.constant 0 : index
    %48 = vector.load %arg9[%c0_24, %c0_25] : memref<1x128xf32, #tpu.memory_space<vmem>>, vector<1x128xf32>
    %cst_26 = arith.constant dense<0.000000e+00> : vector<8x128xf32>
    %49 = tpu.matmul %46, %47, %cst_26 {dimension_numbers = #tpu.dot_dimension_numbers<[1], [0], [0], [1], [0, 0, 1, 1], [], []>} : vector<8x128xf32>, vector<128x128xf32>, vector<8x128xf32> -> vector<8x128xf32>
    %50 = vector.broadcast %48 : vector<1x128xf32> to vector<8x128xf32>
    %51 = arith.addf %49, %50 : vector<8x128xf32>
    %cst_27 = arith.constant 0.000000e+00 : f32
    %52 = vector.broadcast %cst_27 : f32 to vector<8x128xf32>
    %53 = arith.maximumf %51, %52 : vector<8x128xf32>
    %cst_28 = arith.constant dense<0.000000e+00> : vector<128xf32>
    %54 = vector.multi_reduction <add>, %53, %cst_28 [0] : vector<8x128xf32> to vector<128xf32>
    %55 = vector.shape_cast %54 : vector<128xf32> to vector<1x128xf32>
    %cst_29 = arith.constant 8.000000e+00 : f32
    %56 = vector.broadcast %cst_29 : f32 to vector<1x128xf32>
    %57 = arith.divf %55, %56 : vector<1x128xf32>
    %58 = vector.broadcast %57 : vector<1x128xf32> to vector<8x128xf32>
    %59 = arith.subf %53, %58 : vector<8x128xf32>
    %60 = arith.mulf %59, %59 : vector<8x128xf32>
    %cst_30 = arith.constant dense<0.000000e+00> : vector<128xf32>
    %61 = vector.multi_reduction <add>, %60, %cst_30 [0] : vector<8x128xf32> to vector<128xf32>
    %62 = vector.shape_cast %61 : vector<128xf32> to vector<1x128xf32>
    %cst_31 = arith.constant 8.000000e+00 : f32
    %63 = vector.broadcast %cst_31 : f32 to vector<1x128xf32>
    %64 = arith.divf %62, %63 : vector<1x128xf32>
    %cst_32 = arith.constant 9.99999974E-6 : f32
    %65 = vector.broadcast %cst_32 : f32 to vector<1x128xf32>
    %66 = arith.addf %64, %65 : vector<1x128xf32>
    %67 = math.rsqrt %66 : vector<1x128xf32>
    %68 = vector.broadcast %67 : vector<1x128xf32> to vector<8x128xf32>
    %69 = arith.mulf %59, %68 : vector<8x128xf32>
    %c0_33 = arith.constant 0 : index
    %c0_34 = arith.constant 0 : index
    %70 = vector.load %arg5[%c0_33, %c0_34] : memref<128x128xf32, #tpu.memory_space<vmem>>, vector<128x128xf32>
    %c0_35 = arith.constant 0 : index
    %c0_36 = arith.constant 0 : index
    %71 = vector.load %arg10[%c0_35, %c0_36] : memref<1x128xf32, #tpu.memory_space<vmem>>, vector<1x128xf32>
    %cst_37 = arith.constant dense<0.000000e+00> : vector<8x128xf32>
    %72 = tpu.matmul %69, %70, %cst_37 {dimension_numbers = #tpu.dot_dimension_numbers<[1], [0], [0], [1], [0, 0, 1, 1], [], []>} : vector<8x128xf32>, vector<128x128xf32>, vector<8x128xf32> -> vector<8x128xf32>
    %73 = vector.broadcast %71 : vector<1x128xf32> to vector<8x128xf32>
    %74 = arith.addf %72, %73 : vector<8x128xf32>
    %cst_38 = arith.constant 0.000000e+00 : f32
    %75 = vector.broadcast %cst_38 : f32 to vector<8x128xf32>
    %76 = arith.maximumf %74, %75 : vector<8x128xf32>
    %cst_39 = arith.constant dense<0.000000e+00> : vector<128xf32>
    %77 = vector.multi_reduction <add>, %76, %cst_39 [0] : vector<8x128xf32> to vector<128xf32>
    %78 = vector.shape_cast %77 : vector<128xf32> to vector<1x128xf32>
    %cst_40 = arith.constant 8.000000e+00 : f32
    %79 = vector.broadcast %cst_40 : f32 to vector<1x128xf32>
    %80 = arith.divf %78, %79 : vector<1x128xf32>
    %81 = vector.broadcast %80 : vector<1x128xf32> to vector<8x128xf32>
    %82 = arith.subf %76, %81 : vector<8x128xf32>
    %83 = arith.mulf %82, %82 : vector<8x128xf32>
    %cst_41 = arith.constant dense<0.000000e+00> : vector<128xf32>
    %84 = vector.multi_reduction <add>, %83, %cst_41 [0] : vector<8x128xf32> to vector<128xf32>
    %85 = vector.shape_cast %84 : vector<128xf32> to vector<1x128xf32>
    %cst_42 = arith.constant 8.000000e+00 : f32
    %86 = vector.broadcast %cst_42 : f32 to vector<1x128xf32>
    %87 = arith.divf %85, %86 : vector<1x128xf32>
    %cst_43 = arith.constant 9.99999974E-6 : f32
    %88 = vector.broadcast %cst_43 : f32 to vector<1x128xf32>
    %89 = arith.addf %87, %88 : vector<1x128xf32>
    %90 = math.rsqrt %89 : vector<1x128xf32>
    %91 = vector.broadcast %90 : vector<1x128xf32> to vector<8x128xf32>
    %92 = arith.mulf %82, %91 : vector<8x128xf32>
    %c0_44 = arith.constant 0 : index
    %c0_45 = arith.constant 0 : index
    %93 = vector.load %arg6[%c0_44, %c0_45] : memref<128x128xf32, #tpu.memory_space<vmem>>, vector<128x128xf32>
    %cst_46 = arith.constant dense<0.000000e+00> : vector<8x128xf32>
    %94 = tpu.matmul %92, %93, %cst_46 {dimension_numbers = #tpu.dot_dimension_numbers<[1], [0], [0], [1], [0, 0, 1, 1], [], []>} : vector<8x128xf32>, vector<128x128xf32>, vector<8x128xf32> -> vector<8x128xf32>
    %c0_47 = arith.constant 0 : index
    %c0_48 = arith.constant 0 : index
    %95 = vector.load %arg11[%c0_47, %c0_48] : memref<1x128xf32, #tpu.memory_space<vmem>>, vector<1x128xf32>
    %96 = vector.broadcast %95 : vector<1x128xf32> to vector<8x128xf32>
    %97 = arith.addf %94, %96 : vector<8x128xf32>
    %c0_49 = arith.constant 0 : index
    %c0_50 = arith.constant 0 : index
    %98 = vector.load %arg12[%c0_49, %c0_50] : memref<8x128xf32, #tpu.memory_space<vmem>>, vector<8x128xf32>
    tpu.vector_store %arg12[%c0_49, %c0_50], %97 {strides = array<i32>} : memref<8x128xf32, #tpu.memory_space<vmem>>, vector<8x128xf32>,
    return
  }
  func.func @transform_0(%arg0: i32) -> (i32, i32) {
    %c0_i32 = arith.constant 0 : i32
    %c0_i32_0 = arith.constant 0 : i32
    %c0_i32_1 = arith.constant 0 : i32
    return %c0_i32, %c0_i32_0 : i32, i32
  }
  func.func @transform_1(%arg0: i32) -> (i32, i32) {
    %c0_i32 = arith.constant 0 : i32
    %c0_i32_0 = arith.constant 0 : i32
    %c0_i32_1 = arith.constant 0 : i32
    return %c0_i32, %c0_i32_0 : i32, i32
  }
  func.func @transform_2(%arg0: i32) -> (i32, i32) {
    %c0_i32 = arith.constant 0 : i32
    %c0_i32_0 = arith.constant 0 : i32
    %c0_i32_1 = arith.constant 0 : i32
    return %c0_i32, %c0_i32_0 : i32, i32
  }
  func.func @transform_3(%arg0: i32) -> (i32, i32) {
    %c0_i32 = arith.constant 0 : i32
    %c0_i32_0 = arith.constant 0 : i32
    %c0_i32_1 = arith.constant 0 : i32
    return %c0_i32, %c0_i32_0 : i32, i32
  }
  func.func @transform_4(%arg0: i32) -> (i32, i32) {
    %c0_i32 = arith.constant 0 : i32
    %c0_i32_0 = arith.constant 0 : i32
    %c0_i32_1 = arith.constant 0 : i32
    return %c0_i32, %c0_i32_0 : i32, i32
  }
  func.func @transform_5(%arg0: i32) -> (i32, i32) {
    %c0_i32 = arith.constant 0 : i32
    %c0_i32_0 = arith.constant 0 : i32
    %c0_i32_1 = arith.constant 0 : i32
    return %c0_i32, %c0_i32_0 : i32, i32
  }
  func.func @transform_6(%arg0: i32) -> (i32, i32) {
    %c0_i32 = arith.constant 0 : i32
    %c0_i32_0 = arith.constant 0 : i32
    %c0_i32_1 = arith.constant 0 : i32
    return %c0_i32, %c0_i32_0 : i32, i32
  }
  func.func @transform_7(%arg0: i32) -> (i32, i32) {
    %c0_i32 = arith.constant 0 : i32
    %c0_i32_0 = arith.constant 0 : i32
    %c0_i32_1 = arith.constant 0 : i32
    return %c0_i32, %c0_i32_0 : i32, i32
  }
  func.func @transform_8(%arg0: i32) -> (i32, i32) {
    %c0_i32 = arith.constant 0 : i32
    %c0_i32_0 = arith.constant 0 : i32
    %c0_i32_1 = arith.constant 0 : i32
    return %c0_i32, %c0_i32_0 : i32, i32
  }
  func.func @transform_9(%arg0: i32) -> (i32, i32) {
    %c0_i32 = arith.constant 0 : i32
    %c0_i32_0 = arith.constant 0 : i32
    %c0_i32_1 = arith.constant 0 : i32
    return %c0_i32, %c0_i32_0 : i32, i32
  }
  func.func @transform_10(%arg0: i32) -> (i32, i32) {
    %c0_i32 = arith.constant 0 : i32
    %c0_i32_0 = arith.constant 0 : i32
    %c0_i32_1 = arith.constant 0 : i32
    return %c0_i32, %c0_i32_0 : i32, i32
  }
  func.func @transform_11(%arg0: i32) -> (i32, i32) {
    %c0_i32 = arith.constant 0 : i32
    %c0_i32_0 = arith.constant 0 : i32
    %c0_i32_1 = arith.constant 0 : i32
    return %c0_i32, %c0_i32_0 : i32, i32
  }
}

</mosaic_0001>

<bundles_post_ra>
// kernel: tpu_custom_call.1
= control target key start
LH: loop header
LB: loop body
LE: loop exit
PB: predicated region body
PF: predicated region fallthrough
CT: control target
= control target key end

     0   :  { %16 = vsyncpa [#allocation3], 0  ;;  %s1419_s0 = inlined_call_operand.hbm [shape: f32[8,12], index: 0, kind: input, shape index: {}]   ;;  %s1420_s1 = inlined_call_operand.hbm [shape: f32[12,128], index: 1, kind: input, shape index: {}]   ;;  %s1421_s2 = inlined_call_operand.hbm [shape: f32[128,128], index: 2, kind: input, shape index: {}]   ;;  %s1422_s3 = inlined_call_operand.hbm [shape: f32[128,128], index: 3, kind: input, shape index: {}]   ;;  %s1423_s4 = inlined_call_operand.hbm [shape: f32[128,128], index: 4, kind: input, shape index: {}]   ;;  %s1424_s5 = inlined_call_operand.hbm [shape: f32[128,128], index: 5, kind: input, shape index: {}]   ;;  %s1425_s6 = inlined_call_operand.vmem [shape: f32[1,128], index: 6, kind: input, shape index: {}]   ;;  %s1426_s7 = inlined_call_operand.vmem [shape: f32[1,128], index: 7, kind: input, shape index: {}]   ;;  %s1427_s8 = inlined_call_operand.vmem [shape: f32[1,128], index: 8, kind: input, shape index: {}]   ;;  %s1428_s9 = inlined_call_operand.vmem [shape: f32[1,128], index: 9, kind: input, shape index: {}]   ;;  %s1429_s10 = inlined_call_operand.vmem [shape: f32[1,128], index: 10, kind: input, shape index: {}]   ;;  %s1430_s11 = inlined_call_operand.hbm [shape: f32[8,128], index: 11, kind: output, shape index: {}]  }
   0x1   :  { %17 = vsyncpa [#allocation6], 0 }
   0x2   :  { %18 = vsyncpa [#allocation9], 0 }
   0x3   :  { %19 = vsyncpa [#allocation12], 0 }
   0x4   :  { %20 = vsyncpa [#allocation4], 0  ;;  %s1189_s17 = smov [#allocation5]   ;;  %s1025_s21 = scalar_lea.hbm %s1420_s1, 256 }
   0x5   :  { %s36_s18 = sshll.u32 %s1189_s17, 4  ;;  %p1026_p0 = scmp.ne.s32.totalorder %s1420_s1, %s1025_s21  ;;  %s37_s18 = int_to_ptr.vmem [resolvable:$true] %s36_s18 }
   0x6   :  { %p1029_p1 = scmp.lt.u32.totalorder %s1025_s21, %s1420_s1 }
   0x8   :  { %p1031_p2 = pnand %p1029_p1, %p1026_p0 }
   0xa   :  { %1034 = shalt.err (!%p1031_p2)
}
   0xb   :  { %s1035_s26 = scalar_lea.vmem %s37_s18, 256  ;;  %p1040_p4 = scmp.lt.s32.totalorder %s37_s18, %s37_s18 }
   0xc   :  { %p1036_p3 = scmp.ne.s32.totalorder %s37_s18, %s1035_s26  ;;  %p1041_p5 = scmp.lt.s32.totalorder %s1035_s26, %s1035_s26 }
   0xe   :  { %p1042_p6 = por %p1041_p5, %p1040_p4 }
  0x10   :  { %p1043_p7 = pnand %p1042_p6, %p1036_p3 }
  0x12   :  { %1046 = shalt.err (!%p1043_p7)
}
  0x13   :  { %s1190_s27 = smov 128   ;;  %s1191_s28 = smov 8  }
  0x14   :  { %42 = dma.hbm_to_vmem [thread:$0]  %s1420_s1, 256, %s37_s18, [#allocation6], %s1190_s27, %s1190_s27, %s1191_s28  }
  0x15   :  { %s1192_s12 = smov [#allocation8]   ;;  %s1193_s14 = smov [#allocation2]  }
  0x16   :  { %s60_s13 = sshll.u32 %s1192_s12, 4  ;;  %s27_s15 = sshll.u32 %s1193_s14, 4  ;;  %s61_s13 = int_to_ptr.vmem [resolvable:$true] %s60_s13  ;;  %s28_s15 = int_to_ptr.vmem [resolvable:$true] %s27_s15 }
  0x17   :  { %s1047_s19 = scalar_lea.hbm %s1422_s3, 2048 }
  0x18   :  { %p1048_p8 = scmp.ne.s32.totalorder %s1422_s3, %s1047_s19  ;;  %p1051_p9 = scmp.lt.u32.totalorder %s1047_s19, %s1422_s3 }
  0x1a   :  { %p1053_p10 = pnand %p1051_p9, %p1048_p8 }
  0x1c   :  { %1056 = shalt.err (!%p1053_p10)
}
  0x1d   :  { %s1057_s1 = scalar_lea.vmem %s61_s13, 2048  ;;  %p1062_p12 = scmp.lt.s32.totalorder %s61_s13, %s61_s13 }
  0x1e   :  { %p1058_p11 = scmp.ne.s32.totalorder %s61_s13, %s1057_s1  ;;  %p1063_p13 = scmp.lt.s32.totalorder %s1057_s1, %s1057_s1 }
  0x20   :  { %p1064_p0 = por %p1063_p13, %p1062_p12 }
  0x22   :  { %p1065_p1 = pnand %p1064_p0, %p1058_p11 }
  0x24   :  { %1068 = shalt.err (!%p1065_p1)
}
  0x25   :  { %66 = dma.hbm_to_vmem [thread:$0]  %s1422_s3, 2048, %s61_s13, [#allocation9], %s1190_s27, %s1190_s27, %s1191_s28  }
  0x26   :  { %s1069_s29 = scalar_lea.hbm %s1419_s0, 128 }
  0x27   :  { %p1070_p2 = scmp.ne.s32.totalorder %s1419_s0, %s1069_s29  ;;  %p1073_p3 = scmp.lt.u32.totalorder %s1069_s29, %s1419_s0 }
  0x29   :  { %p1075_p4 = pnand %p1073_p3, %p1070_p2 }
  0x2b   :  { %1078 = shalt.err (!%p1075_p4)
}
  0x2c   :  { %s1079_s17 = scalar_lea.vmem %s28_s15, 128  ;;  %p1084_p6 = scmp.lt.s32.totalorder %s28_s15, %s28_s15 }
  0x2d   :  { %p1080_p5 = scmp.ne.s32.totalorder %s28_s15, %s1079_s17  ;;  %p1085_p7 = scmp.lt.s32.totalorder %s1079_s17, %s1079_s17 }
  0x2f   :  { %p1086_p8 = por %p1085_p7, %p1084_p6 }
  0x31   :  { %p1087_p9 = pnand %p1086_p8, %p1080_p5 }
  0x33   :  { %1090 = shalt.err (!%p1087_p9)
}
  0x34   :  { %30 = dma.hbm_to_vmem [thread:$0]  %s1419_s0, 128, %s28_s15, [#allocation3]  }
  0x35   :  { %s1194_s19 = smov [#allocation7]   ;;  %s1195_s21 = smov [#allocation10]  }
  0x36   :  { %s48_s20 = sshll.u32 %s1194_s19, 4  ;;  %s72_s22 = sshll.u32 %s1195_s21, 4  ;;  %s49_s20 = int_to_ptr.vmem [resolvable:$true] %s48_s20  ;;  %s73_s22 = int_to_ptr.vmem [resolvable:$true] %s72_s22 }
  0x37   :  { %s1091_s18 = scalar_lea.hbm %s1421_s2, 2048 }
  0x38   :  { %p1092_p10 = scmp.ne.s32.totalorder %s1421_s2, %s1091_s18  ;;  %p1095_p11 = scmp.lt.u32.totalorder %s1091_s18, %s1421_s2 }
  0x3a   :  { %p1097_p12 = pnand %p1095_p11, %p1092_p10 }
  0x3c   :  { %1100 = shalt.err (!%p1097_p12)
}
  0x3d   :  { %s1101_s0 = scalar_lea.vmem %s49_s20, 2048  ;;  %p1106_p0 = scmp.lt.s32.totalorder %s49_s20, %s49_s20 }
  0x3e   :  { %p1102_p13 = scmp.ne.s32.totalorder %s49_s20, %s1101_s0  ;;  %p1107_p1 = scmp.lt.s32.totalorder %s1101_s0, %s1101_s0 }
  0x40   :  { %p1108_p2 = por %p1107_p1, %p1106_p0 }
  0x42   :  { %p1109_p3 = pnand %p1108_p2, %p1102_p13 }
  0x44   :  { %1112 = shalt.err (!%p1109_p3)
}
  0x45   :  { %54 = dma.hbm_to_vmem [thread:$0]  %s1421_s2, 2048, %s49_s20, [#allocation6], %s1190_s27, %s1190_s27, %s1191_s28  }
  0x46   :  { %s1113_s16 = scalar_lea.hbm %s1423_s4, 2048 }
  0x47   :  { %p1114_p4 = scmp.ne.s32.totalorder %s1423_s4, %s1113_s16  ;;  %p1117_p5 = scmp.lt.u32.totalorder %s1113_s16, %s1423_s4 }
  0x49   :  { %p1119_p6 = pnand %p1117_p5, %p1114_p4 }
  0x4b   :  { %1122 = shalt.err (!%p1119_p6)
}
  0x4c   :  { %s1123_s21 = scalar_lea.vmem %s73_s22, 2048  ;;  %p1128_p8 = scmp.lt.s32.totalorder %s73_s22, %s73_s22 }
  0x4d   :  { %p1124_p7 = scmp.ne.s32.totalorder %s73_s22, %s1123_s21  ;;  %p1129_p9 = scmp.lt.s32.totalorder %s1123_s21, %s1123_s21 }
  0x4f   :  { %p1130_p10 = por %p1129_p9, %p1128_p8 }
  0x51   :  { %p1131_p11 = pnand %p1130_p10, %p1124_p7 }
  0x53   :  { %1134 = shalt.err (!%p1131_p11)
}
  0x54   :  { %78 = dma.hbm_to_vmem [thread:$0]  %s1423_s4, 2048, %s73_s22, [#allocation9], %s1190_s27, %s1190_s27, %s1191_s28  }
  0x55   :  { %s1196_s23 = smov [#allocation11]   ;;  %s1135_s25 = scalar_lea.hbm %s1424_s5, 2048 }
  0x56   :  { %s84_s1 = sshll.u32 %s1196_s23, 4  ;;  %p1136_p12 = scmp.ne.s32.totalorder %s1424_s5, %s1135_s25  ;;  %s85_s1 = int_to_ptr.vmem [resolvable:$true] %s84_s1 }
  0x57   :  { %p1139_p13 = scmp.lt.u32.totalorder %s1135_s25, %s1424_s5 }
  0x59   :  { %p1141_p0 = pnand %p1139_p13, %p1136_p12 }
  0x5b   :  { %1144 = shalt.err (!%p1141_p0)
}
  0x5c   :  { %s1145_s30 = scalar_lea.vmem %s85_s1, 2048  ;;  %p1150_p2 = scmp.lt.s32.totalorder %s85_s1, %s85_s1 }
  0x5d   :  { %p1146_p1 = scmp.ne.s32.totalorder %s85_s1, %s1145_s30  ;;  %p1151_p3 = scmp.lt.s32.totalorder %s1145_s30, %s1145_s30 }
  0x5f   :  { %p1152_p4 = por %p1151_p3, %p1150_p2 }
  0x61   :  { %p1153_p5 = pnand %p1152_p4, %p1146_p1 }
  0x63   :  { %1156 = shalt.err (!%p1153_p5)
}
  0x64   :  { %90 = dma.hbm_to_vmem [thread:$0]  %s1424_s5, 2048, %s85_s1, [#allocation12], %s1190_s27, %s1190_s27, %s1191_s28  }
  0x65   :  { %1179 = dma.done.wait [#allocation3], 128  }
  0x66   :  { %1180 = vsyncadd [#allocation3], 4294967168 }
  0x67   :  { %1181 = dma.done.wait [#allocation6], 2304  }
  0x68   :  { %1182 = vsyncadd [#allocation6], 4294964992 }
  0x69   :  { %1183 = dma.done.wait [#allocation9], 4096  }
  0x6a   :  { %1184 = vsyncadd [#allocation9], 4294963200 }
  0x6b   :  { %1185 = dma.done.wait [#allocation12], 2048  }
  0x6c   :  { %1186 = vsyncadd [#allocation12], 4294965248  ;;  %v1197_v0 = vmov 0.0|0.0   ;;  %vm1198_vm0 = vmmov 0   ;;  %v1199_v1 = vmov 0.0   ;;  %vm133_vm1 = vcmask 1043456  }
  0x6d   :  { %904 = vmatprep.subr.bf16.mxu0 %v1197_v0  ;;  %908 = vmatprep.subr.bf16.mxu1 %v1197_v0  ;;  %v120_v2 = vld [vmem:[#allocation5] sm:$0xff]  ;;  %v121_v3 = vld [vmem:[#allocation5 + $0x8] sm:$0xf]  ;;  %vm1200_vm2 = vmmov 1   ;;  %v119_v5 = vld [vmem:[#allocation2] sm:$0xff]  ;;  %vm129_vm4 = vcmask 97280  }
  0x6e   :  { %761 = vmatprep.mubr.msk.f32.mxu0 %vm1198_vm0, %v1199_v1  ;;  %796 = vmatprep.mubr.msk.f32.mxu1 %vm1198_vm0, %v1199_v1  ;;  %vm906_vm3 = vmpackc.low %vm133_vm1, %vm1200_vm2  ;;  %v905_v4 = vpack.c.bf16 %v121_v3, %v120_v2  ;;  %v228_v6 = vld [vmem:[#allocation7] sm:$0xff]  ;;  %v229_v7 = vld [vmem:[#allocation7 + $0x8] sm:$0xff]  ;;  %s1201_s17 = smov [#allocation13]  }
  0x6f   :  { %v909_v8 = vpack.c.bf16 %v229_v7, %v228_v6  ;;  %v230_v9 = vld [vmem:[#allocation7 + $0x10] sm:$0xff]  ;;  %v231_v10 = vld [vmem:[#allocation7 + $0x18] sm:$0xff]  ;;  %v232_v12 = vld [vmem:[#allocation7 + $0x20] sm:$0xff]  ;;  %s667_s3 = sshll.u32 %s1201_s17, 4  ;;  %s668_s3 = int_to_ptr.vmem [resolvable:$true] %s667_s3 }
  0x70   :  { %907 = vmatpush3.bf16.msk.msra.mxu0 %vm906_vm3, %v905_v4  ;;  %v912_v11 = vpack.c.bf16 %v231_v10, %v230_v9  ;;  %v233_v13 = vld [vmem:[#allocation7 + $0x28] sm:$0xff]  ;;  %v234_v15 = vld [vmem:[#allocation7 + $0x30] sm:$0xff]  ;;  %v235_v16 = vld [vmem:[#allocation7 + $0x38] sm:$0xff]  ;;  %s1157_s13 = scalar_lea.vmem %s668_s3, 128  ;;  %p1162_p7 = scmp.lt.s32.totalorder %s668_s3, %s668_s3 }
  0x71   :  { %932 = vmatprep.subr.bf16.mxu0 %v1197_v0  ;;  %910 = vmatpush3.bf16.msra.mxu1 %v909_v8  ;;  %v915_v14 = vpack.c.bf16 %v233_v13, %v232_v12  ;;  %v918_v17 = vpack.c.bf16 %v235_v16, %v234_v15  ;;  %v236_v18 = vld [vmem:[#allocation7 + $0x40] sm:$0xff]  ;;  %v237_v19 = vld [vmem:[#allocation7 + $0x48] sm:$0xff]  ;;  %v238_v21 = vld [vmem:[#allocation7 + $0x50] sm:$0xff]  ;;  %p1158_p6 = scmp.ne.s32.totalorder %s668_s3, %s1157_s13  ;;  %p1163_p8 = scmp.lt.s32.totalorder %s1157_s13, %s1157_s13 }
  0x72   :  { %911 = vmatprep.subr.bf16.mxu1 %v1197_v0  ;;  %v921_v20 = vpack.c.bf16 %v237_v19, %v236_v18  ;;  %v239_v22 = vld [vmem:[#allocation7 + $0x58] sm:$0xff]  ;;  %v240_v24 = vld [vmem:[#allocation7 + $0x60] sm:$0xff]  ;;  %v241_v25 = vld [vmem:[#allocation7 + $0x68] sm:$0xff] }
  0x73   :  { %762 = vmatmul.mubr.msk.f32.vlgmr.msra.gmra.mrb[0].mxu0 %vm129_vm4, %v119_v5  ;;  %v924_v23 = vpack.c.bf16 %v239_v22, %v238_v21  ;;  %v927_v26 = vpack.c.bf16 %v241_v25, %v240_v24  ;;  %v242_v27 = vld [vmem:[#allocation7 + $0x70] sm:$0xff]  ;;  %v243_v28 = vld [vmem:[#allocation7 + $0x78] sm:$0xff]  ;;  %v679_v30 = vld [vmem:[%s1425_s6] ss:$0 sm:$0xff]  ;;  %p1164_p9 = por %p1163_p8, %p1162_p7 }
  0x74   :  { %831 = vmatprep.mubr.msk.f32.mxu0 %vm1198_vm0, %v1199_v1  ;;  %v930_v29 = vpack.c.bf16 %v243_v28, %v242_v27  ;;  %v341_v54 = vld [vmem:[#allocation8] sm:$0xff]  ;;  %v342_v55 = vld [vmem:[#allocation8 + $0x8] sm:$0xff]  ;;  %v343_v57 = vld [vmem:[#allocation8 + $0x10] sm:$0xff] }
  0x75   :  { %913 = vmatpush3.bf16.msra.mxu1 %v912_v11  ;;  %v933_v56 = vpack.c.bf16 %v342_v55, %v341_v54  ;;  %v344_v58 = vld [vmem:[#allocation8 + $0x18] sm:$0xff]  ;;  %v345_v60 = vld [vmem:[#allocation8 + $0x20] sm:$0xff]  ;;  %v346_v61 = vld [vmem:[#allocation8 + $0x28] sm:$0xff]  ;;  %p1165_p10 = pnand %p1164_p9, %p1158_p6 }
  0x76   :  { %914 = vmatprep.subr.bf16.mxu1 %v1197_v0  ;;  %v936_v59 = vpack.c.bf16 %v344_v58, %v343_v57  ;;  %v939_v62 = vpack.c.bf16 %v346_v61, %v345_v60  ;;  %v347_v63 = vld [vmem:[#allocation8 + $0x30] sm:$0xff]  ;;  %v348_v2 = vld [vmem:[#allocation8 + $0x38] sm:$0xff]  ;;  %v349_v4 = vld [vmem:[#allocation8 + $0x40] sm:$0xff] }
  0x77   :  { %934 = vmatpush3.bf16.msra.mxu0 %v933_v56  ;;  %v942_v3 = vpack.c.bf16 %v348_v2, %v347_v63  ;;  %v350_v5 = vld [vmem:[#allocation8 + $0x48] sm:$0xff]  ;;  %v351_v7 = vld [vmem:[#allocation8 + $0x50] sm:$0xff]  ;;  %v352_v8 = vld [vmem:[#allocation8 + $0x58] sm:$0xff] }
  0x78   :  { %935 = vmatprep.subr.bf16.mxu0 %v1197_v0  ;;  %v945_v6 = vpack.c.bf16 %v350_v5, %v349_v4  ;;  %v948_v9 = vpack.c.bf16 %v352_v8, %v351_v7  ;;  %v353_v10 = vld [vmem:[#allocation8 + $0x60] sm:$0xff]  ;;  %v354_v11 = vld [vmem:[#allocation8 + $0x68] sm:$0xff]  ;;  %v355_v13 = vld [vmem:[#allocation8 + $0x70] sm:$0xff] }
  0x79   :  { %916 = vmatpush3.bf16.msra.mxu1 %v915_v14  ;;  %v951_v12 = vpack.c.bf16 %v354_v11, %v353_v10  ;;  %v356_v14 = vld [vmem:[#allocation8 + $0x78] sm:$0xff]  ;;  %v682_v16 = vld [vmem:[%s1426_s7] ss:$0 sm:$0xff]  ;;  %v464_v54 = vld [vmem:[#allocation10 + $0x50] sm:$0xff] }
  0x7a   :  { %917 = vmatprep.subr.bf16.mxu1 %v1197_v0  ;;  %v954_v15 = vpack.c.bf16 %v356_v14, %v355_v13  ;;  %v465_v55 = vld [vmem:[#allocation10 + $0x58] sm:$0xff]  ;;  %v466_v57 = vld [vmem:[#allocation10 + $0x60] sm:$0xff]  ;;  %v467_v58 = vld [vmem:[#allocation10 + $0x68] sm:$0xff] }
  0x7b   :  { %937 = vmatpush3.bf16.msra.mxu0 %v936_v59  ;;  %v972_v56 = vpack.c.bf16 %v465_v55, %v464_v54  ;;  %v975_v59 = vpack.c.bf16 %v467_v58, %v466_v57  ;;  %v468_v60 = vld [vmem:[#allocation10 + $0x70] sm:$0xff]  ;;  %v469_v61 = vld [vmem:[#allocation10 + $0x78] sm:$0xff]  ;;  %v683_v63 = vld [vmem:[%s1427_s8] ss:$0 sm:$0xff] }
  0x7c   :  { %938 = vmatprep.subr.bf16.mxu0 %v1197_v0 }
  0x7d   :  { %919 = vmatpush3.bf16.msra.mxu1 %v918_v17 }
  0x7e   :  { %920 = vmatprep.subr.bf16.mxu1 %v1197_v0 }
  0x7f   :  { %940 = vmatpush3.bf16.msra.mxu0 %v939_v62  ;;  %v978_v62 = vpack.c.bf16 %v469_v61, %v468_v60 }
  0x80   :  { %941 = vmatprep.subr.bf16.mxu0 %v1197_v0 }
  0x81   :  { %922 = vmatpush3.bf16.msra.mxu1 %v921_v20 }
  0x82   :  { %923 = vmatprep.subr.bf16.mxu1 %v1197_v0 }
  0x83   :  { %943 = vmatpush3.bf16.msra.mxu0 %v942_v3 }
  0x84   :  { %944 = vmatprep.subr.bf16.mxu0 %v1197_v0 }
  0x85   :  { %925 = vmatpush3.bf16.msra.mxu1 %v924_v23 }
  0x86   :  { %926 = vmatprep.subr.bf16.mxu1 %v1197_v0 }
  0x87   :  { %946 = vmatpush3.bf16.msra.mxu0 %v945_v6 }
  0x88   :  { %947 = vmatprep.subr.bf16.mxu0 %v1197_v0 }
  0x89   :  { %928 = vmatpush3.bf16.msra.mxu1 %v927_v26 }
  0x8a   :  { %929 = vmatprep.subr.bf16.mxu1 %v1197_v0 }
  0x8b   :  { %949 = vmatpush3.bf16.msra.mxu0 %v948_v9 }
  0x8c   :  { %950 = vmatprep.subr.bf16.mxu0 %v1197_v0 }
  0x8d   :  { %931 = vmatpush3.bf16.msra.mxu1 %v930_v29 }
  0x8e   :  { %956 = vmatprep.subr.bf16.mxu1 %v1197_v0 }
  0x8f   :  { %952 = vmatpush3.bf16.msra.mxu0 %v951_v12 }
  0x90   :  { %953 = vmatprep.subr.bf16.mxu0 %v1197_v0 }
  0x93   :  { %955 = vmatpush3.bf16.msra.mxu0 %v954_v15 }
  0x94   :  { %980 = vmatprep.subr.bf16.mxu0 %v1197_v0 }
 0x146   :  { %v203_v31 = vpop.f32.mrb[0].mxu0 }
 0x147   :  { %v204_v32 = vadd.f32 %v679_v30, %v203_v31  ;;  %v763_v33 = vpop.f32.mrb[1].mxu0 }
 0x149   :  { %v207_v34 = vmax.f32 %v204_v32, 0.0 }
 0x14b   :  { %v208_v35 = vrot.slane %v207_v34, 4 }
 0x14d   :  { %v209_v36 = vadd.f32 %v208_v35, %v207_v34 }
 0x14f   :  { %v210_v37 = vrot.slane %v209_v36, 2 }
 0x151   :  { %v211_v38 = vadd.f32 %v210_v37, %v209_v36 }
 0x153   :  { %v212_v39 = vrot.slane %v211_v38, 1 }
 0x155   :  { %v213_v40 = vadd.f32 %v212_v39, %v211_v38 }
 0x157   :  { %v215_v41 = vmul.f32 0.125, %v213_v40  ;;  %v454_v40 = vld [vmem:[#allocation10] sm:$0xff] }
 0x159   :  { %v216_v42 = vsub.f32 %v207_v34, %v215_v41  ;;  %v455_v41 = vld [vmem:[#allocation10 + $0x8] sm:$0xff] }
 0x15b   :  { %v217_v43 = vmul.f32 %v216_v42, %v216_v42 }
 0x15d   :  { %v218_v44 = vrot.slane %v217_v43, 4 }
 0x15f   :  { %v219_v45 = vadd.f32 %v218_v44, %v217_v43  ;;  %v456_v43 = vld [vmem:[#allocation10 + $0x10] sm:$0xff]  ;;  %v457_v44 = vld [vmem:[#allocation10 + $0x18] sm:$0xff] }
 0x161   :  { %v220_v46 = vrot.slane %v219_v45, 2 }
 0x163   :  { %v221_v47 = vadd.f32 %v220_v46, %v219_v45  ;;  %v960_v45 = vpack.c.bf16 %v457_v44, %v456_v43  ;;  %v458_v46 = vld [vmem:[#allocation10 + $0x20] sm:$0xff]  ;;  %v580_v44 = vld [vmem:[#allocation11 + $0x68] sm:$0xff] }
 0x164   :  { %v579_v43 = vld [vmem:[#allocation11 + $0x60] sm:$0xff] }
 0x165   :  { %v222_v48 = vrot.slane %v221_v47, 1 }
 0x167   :  { %v223_v49 = vadd.f32 %v222_v48, %v221_v47  ;;  %v459_v47 = vld [vmem:[#allocation10 + $0x28] sm:$0xff] }
 0x168   :  { %v963_v48 = vpack.c.bf16 %v459_v47, %v458_v46  ;;  %v581_v46 = vld [vmem:[#allocation11 + $0x70] sm:$0xff]  ;;  %v582_v47 = vld [vmem:[#allocation11 + $0x78] sm:$0xff] }
 0x169   :  { %v224_v50 = vmul.f32 0.125, %v223_v49  ;;  %v460_v49 = vld [vmem:[#allocation10 + $0x30] sm:$0xff] }
 0x16b   :  { %v225_v51 = vadd.f32 1e-05, %v224_v50 }
 0x16d   :  { %1017 = vrsqrt.f32 %v225_v51  ;;  %v462_v51 = vld [vmem:[#allocation10 + $0x40] sm:$0xff] }
 0x177   :  { %v1018_v52 = vpop.eup %1017 }
 0x178   :  { %v227_v53 = vmul.f32 %v1018_v52, %v216_v42  ;;  %v957_v42 = vpack.c.bf16 %v455_v41, %v454_v40  ;;  %v463_v52 = vld [vmem:[#allocation10 + $0x48] sm:$0xff]  ;;  %v577_v40 = vld [vmem:[#allocation11 + $0x50] sm:$0xff]  ;;  %v578_v41 = vld [vmem:[#allocation11 + $0x58] sm:$0xff] }
 0x17a   :  { %797 = vmatmul.mubr.f32.vlgmr.msra.gmra.mrb[0].mxu1 %v227_v53  ;;  %v969_v53 = vpack.c.bf16 %v463_v52, %v462_v51 }
 0x17b   :  { %866 = vmatprep.mubr.msk.f32.mxu1 %vm1198_vm0, %v1199_v1  ;;  %958 = vmatpush3.bf16.msra.mxu1 %v957_v42  ;;  %v996_v42 = vpack.c.bf16 %v578_v41, %v577_v40 }
 0x17c   :  { %959 = vmatprep.subr.bf16.mxu1 %v1197_v0 }
 0x17f   :  { %961 = vmatpush3.bf16.msra.mxu1 %v960_v45  ;;  %v999_v45 = vpack.c.bf16 %v580_v44, %v579_v43 }
 0x180   :  { %962 = vmatprep.subr.bf16.mxu1 %v1197_v0 }
 0x183   :  { %964 = vmatpush3.bf16.msra.mxu1 %v963_v48  ;;  %v1002_v48 = vpack.c.bf16 %v582_v47, %v581_v46 }
 0x184   :  { %965 = vmatprep.subr.bf16.mxu1 %v1197_v0 }
 0x24d   :  { %v317_v17 = vpop.f32.mrb[0].mxu1 }
 0x24e   :  { %v318_v18 = vadd.f32 %v682_v16, %v317_v17  ;;  %v798_v19 = vpop.f32.mrb[1].mxu1 }
 0x250   :  { %v321_v20 = vmax.f32 %v318_v18, 0.0 }
 0x252   :  { %v322_v21 = vrot.slane %v321_v20, 4 }
 0x254   :  { %v323_v22 = vadd.f32 %v322_v21, %v321_v20 }
 0x256   :  { %v324_v23 = vrot.slane %v323_v22, 2 }
 0x258   :  { %v325_v24 = vadd.f32 %v324_v23, %v323_v22 }
 0x25a   :  { %v326_v25 = vrot.slane %v325_v24, 1 }
 0x25c   :  { %v327_v26 = vadd.f32 %v326_v25, %v325_v24  ;;  %v567_v25 = vld [vmem:[#allocation11] sm:$0xff] }
 0x25e   :  { %v328_v27 = vmul.f32 0.125, %v327_v26  ;;  %v568_v26 = vld [vmem:[#allocation11 + $0x8] sm:$0xff] }
 0x260   :  { %v329_v28 = vsub.f32 %v321_v20, %v328_v27  ;;  %v981_v27 = vpack.c.bf16 %v568_v26, %v567_v25 }
 0x262   :  { %v330_v29 = vmul.f32 %v329_v28, %v329_v28 }
 0x264   :  { %v331_v30 = vrot.slane %v330_v29, 4 }
 0x266   :  { %v332_v31 = vadd.f32 %v331_v30, %v330_v29  ;;  %v570_v29 = vld [vmem:[#allocation11 + $0x18] sm:$0xff] }
 0x268   :  { %v333_v32 = vrot.slane %v332_v31, 2 }
 0x26a   :  { %v334_v33 = vadd.f32 %v333_v32, %v332_v31  ;;  %v571_v31 = vld [vmem:[#allocation11 + $0x20] sm:$0xff]  ;;  %v572_v32 = vld [vmem:[#allocation11 + $0x28] sm:$0xff] }
 0x26c   :  { %v335_v34 = vrot.slane %v334_v33, 1 }
 0x26e   :  { %v336_v35 = vadd.f32 %v335_v34, %v334_v33  ;;  %v987_v33 = vpack.c.bf16 %v572_v32, %v571_v31  ;;  %v573_v34 = vld [vmem:[#allocation11 + $0x30] sm:$0xff] }
 0x270   :  { %v337_v36 = vmul.f32 0.125, %v336_v35  ;;  %v574_v35 = vld [vmem:[#allocation11 + $0x38] sm:$0xff] }
 0x272   :  { %v338_v37 = vadd.f32 1e-05, %v337_v36  ;;  %v990_v36 = vpack.c.bf16 %v574_v35, %v573_v34 }
 0x274   :  { %1019 = vrsqrt.f32 %v338_v37  ;;  %v575_v37 = vld [vmem:[#allocation11 + $0x40] sm:$0xff] }
 0x27e   :  { %v1020_v38 = vpop.eup %1019 }
 0x27f   :  { %v340_v39 = vmul.f32 %v1020_v38, %v329_v28  ;;  %v569_v28 = vld [vmem:[#allocation11 + $0x10] sm:$0xff]  ;;  %v576_v38 = vld [vmem:[#allocation11 + $0x48] sm:$0xff] }
 0x280   :  { %v984_v30 = vpack.c.bf16 %v570_v29, %v569_v28 }
 0x281   :  { %832 = vmatmul.mubr.f32.vlgmr.msra.gmra.mrb[2].mxu0 %v340_v39  ;;  %v993_v39 = vpack.c.bf16 %v576_v38, %v575_v37 }
 0x282   :  { %901 = vmatprep.mubr.msk.f32.mxu0 %vm1198_vm0, %v1199_v1  ;;  %v461_v1 = vld [vmem:[#allocation10 + $0x38] sm:$0xff]  ;;  %982 = vmatpush3.bf16.msra.mxu0 %v981_v27 }
 0x283   :  { %v966_v50 = vpack.c.bf16 %v461_v1, %v460_v49  ;;  %983 = vmatprep.subr.bf16.mxu0 %v1197_v0  ;;  %v684_v49 = vld [vmem:[%s1428_s9] ss:$0 sm:$0xff] }
 0x285   :  { %967 = vmatpush3.bf16.msra.mxu1 %v966_v50 }
 0x286   :  { %968 = vmatprep.subr.bf16.mxu1 %v1197_v0  ;;  %985 = vmatpush3.bf16.msra.mxu0 %v984_v30 }
 0x287   :  { %986 = vmatprep.subr.bf16.mxu0 %v1197_v0 }
 0x289   :  { %970 = vmatpush3.bf16.msra.mxu1 %v969_v53 }
 0x28a   :  { %971 = vmatprep.subr.bf16.mxu1 %v1197_v0  ;;  %988 = vmatpush3.bf16.msra.mxu0 %v987_v33 }
 0x28b   :  { %989 = vmatprep.subr.bf16.mxu0 %v1197_v0 }
 0x28d   :  { %973 = vmatpush3.bf16.msra.mxu1 %v972_v56 }
 0x28e   :  { %974 = vmatprep.subr.bf16.mxu1 %v1197_v0  ;;  %991 = vmatpush3.bf16.msra.mxu0 %v990_v36 }
 0x28f   :  { %992 = vmatprep.subr.bf16.mxu0 %v1197_v0 }
 0x291   :  { %976 = vmatpush3.bf16.msra.mxu1 %v975_v59 }
 0x292   :  { %977 = vmatprep.subr.bf16.mxu1 %v1197_v0  ;;  %994 = vmatpush3.bf16.msra.mxu0 %v993_v39 }
 0x293   :  { %995 = vmatprep.subr.bf16.mxu0 %v1197_v0 }
 0x295   :  { %979 = vmatpush3.bf16.msra.mxu1 %v978_v62 }
 0x296   :  { %997 = vmatpush3.bf16.msra.mxu0 %v996_v42 }
 0x297   :  { %998 = vmatprep.subr.bf16.mxu0 %v1197_v0 }
 0x29a   :  { %1000 = vmatpush3.bf16.msra.mxu0 %v999_v45 }
 0x29b   :  { %1001 = vmatprep.subr.bf16.mxu0 %v1197_v0 }
 0x29e   :  { %1003 = vmatpush3.bf16.msra.mxu0 %v1002_v48 }
 0x354   :  { %v430_v2 = vpop.f32.mrb[2].mxu0 }
 0x355   :  { %v431_v3 = vadd.f32 %v683_v63, %v430_v2  ;;  %v833_v4 = vpop.f32.mrb[3].mxu0 }
 0x357   :  { %v434_v5 = vmax.f32 %v431_v3, 0.0 }
 0x359   :  { %v435_v6 = vrot.slane %v434_v5, 4 }
 0x35b   :  { %v436_v7 = vadd.f32 %v435_v6, %v434_v5 }
 0x35d   :  { %v437_v8 = vrot.slane %v436_v7, 2 }
 0x35f   :  { %v438_v9 = vadd.f32 %v437_v8, %v436_v7 }
 0x361   :  { %v439_v10 = vrot.slane %v438_v9, 1 }
 0x363   :  { %v440_v11 = vadd.f32 %v439_v10, %v438_v9  ;;  %v685_v9 = vld [vmem:[%s1429_s10] ss:$0 sm:$0xff] }
 0x365   :  { %v441_v12 = vmul.f32 0.125, %v440_v11 }
 0x367   :  { %v442_v13 = vsub.f32 %v434_v5, %v441_v12 }
 0x369   :  { %v443_v14 = vmul.f32 %v442_v13, %v442_v13 }
 0x36b   :  { %v444_v15 = vrot.slane %v443_v14, 4 }
 0x36d   :  { %v445_v16 = vadd.f32 %v444_v15, %v443_v14 }
 0x36f   :  { %v446_v17 = vrot.slane %v445_v16, 2 }
 0x371   :  { %v447_v18 = vadd.f32 %v446_v17, %v445_v16 }
 0x373   :  { %v448_v19 = vrot.slane %v447_v18, 1 }
 0x375   :  { %v449_v20 = vadd.f32 %v448_v19, %v447_v18 }
 0x377   :  { %v450_v21 = vmul.f32 0.125, %v449_v20 }
 0x379   :  { %v451_v22 = vadd.f32 1e-05, %v450_v21 }
 0x37b   :  { %1021 = vrsqrt.f32 %v451_v22 }
 0x385   :  { %v1022_v23 = vpop.eup %1021 }
 0x386   :  { %v453_v24 = vmul.f32 %v1022_v23, %v442_v13 }
 0x388   :  { %867 = vmatmul.mubr.f32.vlgmr.msra.gmra.mrb[2].mxu1 %v453_v24 }
 0x45b   :  { %v543_v1 = vpop.f32.mrb[2].mxu1 }
 0x45c   :  { %v544_v50 = vadd.f32 %v684_v49, %v543_v1  ;;  %v868_v51 = vpop.f32.mrb[3].mxu1 }
 0x45e   :  { %v547_v52 = vmax.f32 %v544_v50, 0.0 }
 0x460   :  { %v548_v53 = vrot.slane %v547_v52, 4 }
 0x462   :  { %v549_v54 = vadd.f32 %v548_v53, %v547_v52 }
 0x464   :  { %v550_v55 = vrot.slane %v549_v54, 2 }
 0x466   :  { %v551_v56 = vadd.f32 %v550_v55, %v549_v54 }
 0x468   :  { %v552_v57 = vrot.slane %v551_v56, 1 }
 0x46a   :  { %v553_v58 = vadd.f32 %v552_v57, %v551_v56 }
 0x46c   :  { %v554_v59 = vmul.f32 0.125, %v553_v58 }
 0x46e   :  { %v555_v60 = vsub.f32 %v547_v52, %v554_v59 }
 0x470   :  { %v556_v61 = vmul.f32 %v555_v60, %v555_v60 }
 0x472   :  { %v557_v62 = vrot.slane %v556_v61, 4 }
 0x474   :  { %v558_v0 = vadd.f32 %v557_v62, %v556_v61 }
 0x476   :  { %v559_v63 = vrot.slane %v558_v0, 2 }
 0x478   :  { %v560_v2 = vadd.f32 %v559_v63, %v558_v0 }
 0x47a   :  { %v561_v3 = vrot.slane %v560_v2, 1 }
 0x47c   :  { %v562_v4 = vadd.f32 %v561_v3, %v560_v2 }
 0x47e   :  { %v563_v5 = vmul.f32 0.125, %v562_v4 }
 0x480   :  { %v564_v6 = vadd.f32 1e-05, %v563_v5 }
 0x482   :  { %1023 = vrsqrt.f32 %v564_v6 }
 0x48c   :  { %v1024_v7 = vpop.eup %1023 }
 0x48d   :  { %v566_v8 = vmul.f32 %v1024_v7, %v555_v60 }
 0x48f   :  { %902 = vmatmul.mubr.f32.vlgmr.msra.gmra.mrb[4].mxu0 %v566_v8 }
 0x562   :  { %v656_v10 = vpop.f32.mrb[4].mxu0 }
 0x563   :  { %v657_v11 = vadd.f32 %v685_v9, %v656_v10  ;;  %v903_v12 = vpop.f32.mrb[5].mxu0 }
 0x565   :  { %660 = vst [vmem:[#allocation13] sm:$0xff] %v657_v11 }
 0x566   :  { %1168 = shalt.err (!%p1165_p10)
}
 0x567   :  { %s1169_s2 = scalar_lea.hbm %s1430_s11, 128 }
 0x568   :  { %p1170_p11 = scmp.ne.s32.totalorder %s1430_s11, %s1169_s2  ;;  %p1173_p12 = scmp.lt.u32.totalorder %s1169_s2, %s1430_s11 }
 0x56a   :  { %p1175_p13 = pnand %p1173_p12, %p1170_p11 }
 0x56c   :  { %1178 = shalt.err (!%p1175_p13)
}
 0x56d   :  { %670 = dma.vmem_to_hbm [thread:$0]  %s668_s3, 128, %s1430_s11, [#allocation4]  }
 0x56e   :  { %1187 = dma.done.wait [#allocation4], 128  }
 0x56f   :  { %1188 = vsyncadd [#allocation4], 4294967168 }
 0x570   :  { %674 = vsyncpa [#allocation3], 1 }
 0x571   :  { %675 = vsyncpa [#allocation6], 1 }
 0x572   :  { %676 = vsyncpa [#allocation9], 1 }
 0x573   :  { %677 = vsyncpa [#allocation12], 1 }
 0x574   :  { %678 = vsyncpa [#allocation4], 1 }

</bundles_post_ra>
